<compile_context>
chip_gen: v7x
topology: tpu7x:2x2x1
jax: 0.10.0
libtpu: 0.0.40
codegen_flags: <defaults>
</compile_context>

<pallas_src>
import jax
import jax.numpy as jnp
import numpy as np
from jax.experimental import pallas as pl
from jax.experimental.pallas import tpu as pltpu

_SIXTH = 1.0 / 6.0  # constant-fold so the kernel emits a vmul, not a divide


def _h_sigmoid_kernel(x_ref, o_ref):
    x = x_ref[...]
    # ReLU6(x + 3) * (1/6)  -- add, clamp, clamp, mul: all VPU, no EUP/XLU/MXU.
    y = jnp.minimum(jnp.maximum(x + 3.0, 0.0), 6.0) * _SIXTH
    o_ref[...] = y.astype(o_ref.dtype)


def _target_block_bytes():
    """Per-generation block byte budget (2 arrays x 2 buffers must fit scoped VMEM)."""
    try:
        kind = jax.devices()[0].device_kind.lower()
    except Exception:
        kind = ""
    if ("v6" in kind) or ("v7" in kind):
        return 4 << 20   # 4 MiB block -> 16 MiB buffers, under 32 MiB scoped default
    return 2 << 20       # conservative (v5e scoped default is 16 MiB)


def _launch(x2, tm):
    rows, cols = x2.shape
    return pl.pallas_call(
        _h_sigmoid_kernel,
        out_shape=jax.ShapeDtypeStruct((rows, cols), x2.dtype),
        grid=(rows // tm,),
        in_specs=[pl.BlockSpec((tm, cols), lambda i: (i, 0))],
        out_specs=pl.BlockSpec((tm, cols), lambda i: (i, 0)),
        compiler_params=pltpu.CompilerParams(
            dimension_semantics=("parallel",),   # lets v7x shard rows across its 2 TCs
        ),
    )(x2)


def h_sigmoid(x):
    """Elementwise hard-sigmoid for an array of any shape/rank."""
    orig_shape = x.shape
    dtype = x.dtype
    n = x.size
    if n == 0:
        return x

    itemsize = jnp.dtype(dtype).itemsize
    sub = 8 * max(1, 4 // itemsize)          # sublane multiple: 8 f32, 16 bf16, 32 int8
    target = _target_block_bytes()
    flat = x.reshape(-1)

    # --- Fast path A: zero-copy tiled slab (no pad, no slice). -------------
    cols = None
    for cand in range(1024, 0, -128):        # 1024, 896, ..., 128  (lane-dense)
        if n % cand == 0 and (n // cand) % sub == 0:
            cols = cand
            break
    if cols is not None:
        rows = n // cols
        max_tm = max(sub, (target // (cols * itemsize)) // sub * sub)
        tm = sub
        while rows % (tm * 2) == 0 and tm * 2 <= max_tm:
            tm *= 2
        # Single-step grid: split in two so both v7x TensorCores get work.
        if tm == rows and rows % 2 == 0 and (rows // 2) % sub == 0:
            tm = rows // 2
        out2 = _launch(flat.reshape(rows, cols), tm)
        return out2.reshape(orig_shape)

    # --- Fast path B: zero-copy single full-array block (exempt from (8,128)). ---
    for cand in range(1024, 0, -128):
        if n % cand == 0:
            rows = n // cand
            if rows * cand * itemsize <= target:
                out2 = _launch(flat.reshape(rows, cand), rows)
                return out2.reshape(orig_shape)
            break

    # --- Slow path: pad to a lane-dense slab, slice the pad back off. ------
    cols = 1024 if n >= 8 * 1024 else 128
    rows = -(-n // cols)                     # ceil-div
    rows = -(-rows // sub) * sub             # sublane multiple for this dtype
    max_tm = max(sub, (target // (cols * itemsize)) // sub * sub)
    tm = min(max_tm, rows)
    rows = -(-rows // tm) * tm               # grid needs an integer step count
    pad = rows * cols - n
    flat = jnp.pad(flat, (0, pad))           # padded lanes computed then discarded
    out2 = _launch(flat.reshape(rows, cols), tm)
    return out2.reshape(-1)[:n].reshape(orig_shape)


def reference(x):
    """Pure-JAX mirror of the PyTorch forward: ReLU6(x + 3) / 6."""
    return jnp.minimum(jnp.maximum(x + 3.0, 0.0), 6.0) / 6.0


if __name__ == "__main__":
    key = jax.random.PRNGKey(0)

    # Small shape consistent with typical use of h_sigmoid inside a conv net.
    N, C, H, W = 2, 4, 16, 16
    x = 6.0 * jax.random.normal(key, (N, C, H, W), jnp.float32)  # spans both clamp regions
    out = jax.block_until_ready(h_sigmoid(x))
    np.testing.assert_allclose(np.asarray(out), np.asarray(reference(x)),
                               atol=1e-6, rtol=1e-6)

    # Ragged shape to exercise the padded fallback path.
    x2 = 6.0 * jax.random.normal(jax.random.PRNGKey(1), (3, 5, 7), jnp.float32)
    out2 = jax.block_until_ready(h_sigmoid(x2))
    np.testing.assert_allclose(np.asarray(out2), np.asarray(reference(x2)),
                               atol=1e-6, rtol=1e-6)

    print("KERNEL_OK")
</pallas_src>

<mosaic_0001>
module attributes {stable_mosaic.version = 11 : i64} {
  func.func @_h_sigmoid_kernel(%arg0: i32, %arg1: memref<8x256xf32, #tpu.memory_space<vmem>>, %arg2: memref<8x256xf32, #tpu.memory_space<vmem>>) attributes {dimension_semantics = [#tpu.dimension_semantics<parallel>], iteration_bounds = array<i64: 1>, scalar_prefetch = 0 : i64, scratch_operands = 0 : i64, tpu.core_type = #tpu.core_type<tc>, window_params = [{transform_indices = @transform_0, window_bounds = array<i64: 8, 256>}, {transform_indices = @transform_1, window_bounds = array<i64: 8, 256>}]} {
    %c0 = arith.constant 0 : index
    %c0_0 = arith.constant 0 : index
    %0 = vector.load %arg1[%c0, %c0_0] : memref<8x256xf32, #tpu.memory_space<vmem>>, vector<8x256xf32>
    %cst = arith.constant 3.000000e+00 : f32
    %1 = vector.broadcast %cst : f32 to vector<8x256xf32>
    %2 = arith.addf %0, %1 : vector<8x256xf32>
    %cst_1 = arith.constant 0.000000e+00 : f32
    %3 = vector.broadcast %cst_1 : f32 to vector<8x256xf32>
    %4 = arith.maximumf %2, %3 : vector<8x256xf32>
    %cst_2 = arith.constant 6.000000e+00 : f32
    %5 = vector.broadcast %cst_2 : f32 to vector<8x256xf32>
    %6 = arith.minimumf %4, %5 : vector<8x256xf32>
    %cst_3 = arith.constant 0.166666672 : f32
    %7 = vector.broadcast %cst_3 : f32 to vector<8x256xf32>
    %8 = arith.mulf %6, %7 : vector<8x256xf32>
    %c0_4 = arith.constant 0 : index
    %c0_5 = arith.constant 0 : index
    %9 = vector.load %arg2[%c0_4, %c0_5] : memref<8x256xf32, #tpu.memory_space<vmem>>, vector<8x256xf32>
    tpu.vector_store %arg2[%c0_4, %c0_5], %8 {strides = array<i32>} : memref<8x256xf32, #tpu.memory_space<vmem>>, vector<8x256xf32>,
    return
  }
  func.func @transform_0(%arg0: i32) -> (i32, i32) {
    %c0_i32 = arith.constant 0 : i32
    %c0_i32_0 = arith.constant 0 : i32
    return %arg0, %c0_i32 : i32, i32
  }
  func.func @transform_1(%arg0: i32) -> (i32, i32) {
    %c0_i32 = arith.constant 0 : i32
    %c0_i32_0 = arith.constant 0 : i32
    return %arg0, %c0_i32 : i32, i32
  }
}

</mosaic_0001>

<bundles_post_ra>
// kernel: tpu_custom_call.1
= control target key start
LH: loop header
LB: loop body
LE: loop exit
PB: predicated region body
PF: predicated region fallthrough
CT: control target
= control target key end

     0   :  { %6 = vsyncpa [#allocation3], 0  ;;  %s134_s0 = inlined_call_operand.hbm [shape: f32[8,256], index: 0, kind: input, shape index: {}]   ;;  %s135_s1 = inlined_call_operand.hbm [shape: f32[8,256], index: 1, kind: output, shape index: {}]  }
   0x1   :  { %7 = vsyncpa [#allocation4], 0  ;;  %s98_s6 = smov [#allocation2]   ;;  %s50_s10 = scalar_lea.hbm %s134_s0, 256 }
   0x2   :  { %s14_s7 = sshll.u32 %s98_s6, 4  ;;  %p51_p0 = scmp.ne.s32.totalorder %s134_s0, %s50_s10  ;;  %s15_s7 = int_to_ptr.vmem [resolvable:$true] %s14_s7 }
   0x3   :  { %p54_p1 = scmp.lt.u32.totalorder %s50_s10, %s134_s0 }
   0x5   :  { %p56_p2 = pnand %p54_p1, %p51_p0 }
   0x7   :  { %59 = shalt.err (!%p56_p2)
}
   0x8   :  { %s60_s15 = scalar_lea.vmem %s15_s7, 256  ;;  %p65_p4 = scmp.lt.s32.totalorder %s15_s7, %s15_s7 }
   0x9   :  { %p61_p3 = scmp.ne.s32.totalorder %s15_s7, %s60_s15  ;;  %p66_p5 = scmp.lt.s32.totalorder %s60_s15, %s60_s15 }
   0xb   :  { %p67_p6 = por %p66_p5, %p65_p4 }
   0xd   :  { %p68_p7 = pnand %p67_p6, %p61_p3 }
   0xf   :  { %71 = shalt.err (!%p68_p7)
}
  0x10   :  { %17 = dma.hbm_to_vmem [thread:$0]  %s134_s0, 256, %s15_s7, [#allocation3]  }
  0x11   :  { %94 = dma.done.wait [#allocation3], 256  }
  0x12   :  { %95 = vsyncadd [#allocation3], 4294967040  ;;  %v21_v0 = vld [vmem:[#allocation2] sm:$0xff]  ;;  %v22_v1 = vld [vmem:[#allocation2 + $0x8] sm:$0xff]  ;;  %s99_s18 = smov [#allocation5]  }
  0x13   :  { %v23_v2 = vadd.f32 3.0, %v21_v0  ;;  %v24_v3 = vadd.f32 3.0, %v22_v1  ;;  %s39_s19 = sshll.u32 %s99_s18, 4  ;;  %s40_s19 = int_to_ptr.vmem [resolvable:$true] %s39_s19 }
  0x14   :  { %s72_s20 = scalar_lea.vmem %s40_s19, 256  ;;  %p77_p9 = scmp.lt.s32.totalorder %s40_s19, %s40_s19 }
  0x15   :  { %v25_v4 = vmax.f32 %v23_v2, 0.0  ;;  %v26_v5 = vmax.f32 %v24_v3, 0.0  ;;  %p73_p8 = scmp.ne.s32.totalorder %s40_s19, %s72_s20  ;;  %p78_p10 = scmp.lt.s32.totalorder %s72_s20, %s72_s20 }
  0x17   :  { %v27_v6 = vmin.f32 %v25_v4, 6.0  ;;  %v28_v7 = vmin.f32 %v26_v5, 6.0  ;;  %p79_p11 = por %p78_p10, %p77_p9 }
  0x19   :  { %v29_v8 = vmul.f32 0.16666667, %v27_v6  ;;  %v30_v9 = vmul.f32 0.16666667, %v28_v7  ;;  %p80_p12 = pnand %p79_p11, %p73_p8 }
  0x1b   :  { %31 = vst [vmem:[#allocation5] sm:$0xff] %v29_v8  ;;  %32 = vst [vmem:[#allocation5 + $0x8] sm:$0xff] %v30_v9 }
  0x1c   :  { %83 = shalt.err (!%p80_p12)
}
  0x1d   :  { %s84_s22 = scalar_lea.hbm %s135_s1, 256 }
  0x1e   :  { %p85_p13 = scmp.ne.s32.totalorder %s135_s1, %s84_s22  ;;  %p88_p0 = scmp.lt.u32.totalorder %s84_s22, %s135_s1 }
  0x20   :  { %p90_p1 = pnand %p88_p0, %p85_p13 }
  0x22   :  { %93 = shalt.err (!%p90_p1)
}
  0x23   :  { %42 = dma.vmem_to_hbm [thread:$0]  %s40_s19, 256, %s135_s1, [#allocation4]  }
  0x24   :  { %96 = dma.done.wait [#allocation4], 256  }
  0x25   :  { %97 = vsyncadd [#allocation4], 4294967040 }
  0x26   :  { %46 = vsyncpa [#allocation3], 1 }
  0x27   :  { %47 = vsyncpa [#allocation4], 1 }

</bundles_post_ra>
